<compile_context>
chip_gen: v7x
topology: tpu7x:2x2x1
jax: 0.10.0
libtpu: 0.0.40
codegen_flags: <defaults>
</compile_context>

<pallas_src>
import jax
import jax.numpy as jnp
from jax.experimental import pallas as pl
from jax.experimental.pallas import tpu as pltpu

LANE = 128


def _round_up(n, m):
    return ((n + m - 1) // m) * m


def mlp_kernel(x_ref, w1_ref, b1_ref, w2_ref, b2_ref, o_ref):
    # x: (TB, IN) bf16, w1: (IN, Hp) bf16, b1: (1, Hp) f32,
    # w2: (Hp, OUTp) bf16, b2: (1, OUTp) f32, o: (TB, OUTp) f32
    x = x_ref[...]
    h = jnp.dot(x, w1_ref[...], preferred_element_type=jnp.float32) + b1_ref[...]
    # Sigmoid in f32: exp on the EUP, approximate reciprocal on the EUP
    # (both off the VPU critical path).
    e = jnp.exp(-h)
    s = pl.reciprocal(1.0 + e, approx=True)
    y = jnp.dot(s.astype(jnp.bfloat16), w2_ref[...],
                preferred_element_type=jnp.float32) + b2_ref[...]
    o_ref[...] = y.astype(o_ref.dtype)


def net_forward(x, w1, b1, w2, b2, *, block_batch=256):
    """y = sigmoid(x @ w1 + b1) @ w2 + b2, computed with a batch-tiled Pallas kernel."""
    batch, in_features = x.shape
    hidden = w1.shape[1]
    out_features = w2.shape[1]

    # Lane-dense padded feature dims.
    hid_p = _round_up(hidden, LANE)
    out_p = _round_up(out_features, LANE)

    # Batch tile: multiple of 16 (bf16 sublane packing), capped at block_batch.
    tb = min(block_batch, _round_up(batch, 16))
    batch_p = _round_up(batch, tb)

    # Zero-padded operands. bf16 for MXU inputs, biases stay f32.
    x_p = jnp.zeros((batch_p, in_features), jnp.bfloat16)
    x_p = x_p.at[:batch].set(x.astype(jnp.bfloat16))
    w1_p = jnp.zeros((in_features, hid_p), jnp.bfloat16)
    w1_p = w1_p.at[:, :hidden].set(w1.astype(jnp.bfloat16))
    b1_p = jnp.zeros((1, hid_p), jnp.float32)
    b1_p = b1_p.at[:, :hidden].set(b1.reshape(1, hidden).astype(jnp.float32))
    # Padded hidden rows of w2 are zero => sigmoid(0)=0.5 leaks nothing.
    w2_p = jnp.zeros((hid_p, out_p), jnp.bfloat16)
    w2_p = w2_p.at[:hidden, :out_features].set(w2.astype(jnp.bfloat16))
    b2_p = jnp.zeros((1, out_p), jnp.float32)
    b2_p = b2_p.at[:, :out_features].set(b2.reshape(1, out_features).astype(jnp.float32))

    grid = (batch_p // tb,)

    cost = pl.CostEstimate(
        flops=2 * batch_p * (in_features * hid_p + hid_p * out_p),
        transcendentals=batch_p * hid_p,
        bytes_accessed=(x_p.size * 2 + w1_p.size * 2 + w2_p.size * 2
                        + b1_p.size * 4 + b2_p.size * 4 + batch_p * out_p * 4),
    )

    out_padded = pl.pallas_call(
        mlp_kernel,
        out_shape=jax.ShapeDtypeStruct((batch_p, out_p), jnp.float32),
        grid=grid,
        in_specs=[
            pl.BlockSpec((tb, in_features), lambda i: (i, 0)),   # x: tiled over batch
            pl.BlockSpec((in_features, hid_p), lambda i: (0, 0)),  # w1: resident
            pl.BlockSpec((1, hid_p), lambda i: (0, 0)),            # b1: resident
            pl.BlockSpec((hid_p, out_p), lambda i: (0, 0)),        # w2: resident
            pl.BlockSpec((1, out_p), lambda i: (0, 0)),            # b2: resident
        ],
        out_specs=pl.BlockSpec((tb, out_p), lambda i: (i, 0)),     # lane-dense output
        compiler_params=pltpu.CompilerParams(
            dimension_semantics=("parallel",)),
        cost_estimate=cost,
    )(x_p, w1_p, b1_p, w2_p, b2_p)

    # Strip batch / lane padding back to the logical shape.
    return out_padded[:batch, :out_features]


def init_params(key, in_features, hidden, out_features):
    # Mimic PyTorch nn.Linear default init: U(-1/sqrt(fan_in), 1/sqrt(fan_in)),
    # deterministic via PRNGKey (synthetic weights, no checkpoint load).
    k1, k2, k3, k4 = jax.random.split(key, 4)
    bound1 = 1.0 / jnp.sqrt(in_features)
    bound2 = 1.0 / jnp.sqrt(hidden)
    w1 = jax.random.uniform(k1, (in_features, hidden), jnp.float32, -bound1, bound1)
    b1 = jax.random.uniform(k2, (1, hidden), jnp.float32, -bound1, bound1)
    w2 = jax.random.uniform(k3, (hidden, out_features), jnp.float32, -bound2, bound2)
    b2 = jax.random.uniform(k4, (1, out_features), jnp.float32, -bound2, bound2)
    return w1, b1, w2, b2


if __name__ == "__main__":
    # train_x.shape[1] -> in_features, train_y.shape[1] -> out_features (synthetic choices)
    batch, in_features, hidden, out_features = 8, 32, 64, 8

    key = jax.random.PRNGKey(0)
    kx, kp = jax.random.split(key)
    x = jax.random.normal(kx, (batch, in_features), jnp.float32)
    w1, b1, w2, b2 = init_params(kp, in_features, hidden, out_features)

    out = net_forward(x, w1, b1, w2, b2)
    jax.block_until_ready(out)

    # Pure-JAX f32 reference of the same forward pass (kernel uses bf16 MXU
    # inputs + approx reciprocal, so compare with bf16-appropriate tolerance).
    ref = jnp.dot(x, w1) + b1
    ref = 1.0 / (1.0 + jnp.exp(-ref))
    ref = jnp.dot(ref, w2) + b2
    assert out.shape == (batch, out_features)
    assert jnp.allclose(out, ref, atol=2e-2, rtol=2e-2), (
        float(jnp.max(jnp.abs(out - ref))))

    print("KERNEL_OK")
</pallas_src>

<mosaic_0001>
module attributes {stable_mosaic.version = 11 : i64} {
  func.func @mlp_kernel(%arg0: i32, %arg1: memref<16x32xbf16, #tpu.memory_space<vmem>>, %arg2: memref<32x128xbf16, #tpu.memory_space<vmem>>, %arg3: memref<1x128xf32, #tpu.memory_space<vmem>>, %arg4: memref<128x128xbf16, #tpu.memory_space<vmem>>, %arg5: memref<1x128xf32, #tpu.memory_space<vmem>>, %arg6: memref<16x128xf32, #tpu.memory_space<vmem>>) attributes {dimension_semantics = [#tpu.dimension_semantics<parallel>], iteration_bounds = array<i64: 1>, scalar_prefetch = 0 : i64, scratch_operands = 0 : i64, tpu.core_type = #tpu.core_type<tc>, window_params = [{transform_indices = @transform_0, window_bounds = array<i64: 16, 32>}, {pipeline_mode = #tpu.pipeline_mode<synchronous>, transform_indices = @transform_1, window_bounds = array<i64: 32, 128>}, {pipeline_mode = #tpu.pipeline_mode<synchronous>, transform_indices = @transform_2, window_bounds = array<i64: 1, 128>}, {pipeline_mode = #tpu.pipeline_mode<synchronous>, transform_indices = @transform_3, window_bounds = array<i64: 128, 128>}, {pipeline_mode = #tpu.pipeline_mode<synchronous>, transform_indices = @transform_4, window_bounds = array<i64: 1, 128>}, {transform_indices = @transform_5, window_bounds = array<i64: 16, 128>}]} {
    %c0 = arith.constant 0 : index
    %c0_0 = arith.constant 0 : index
    %0 = vector.load %arg1[%c0, %c0_0] : memref<16x32xbf16, #tpu.memory_space<vmem>>, vector<16x32xbf16>
    %c0_1 = arith.constant 0 : index
    %c0_2 = arith.constant 0 : index
    %1 = vector.load %arg2[%c0_1, %c0_2] : memref<32x128xbf16, #tpu.memory_space<vmem>>, vector<32x128xbf16>
    %cst = arith.constant dense<0.000000e+00> : vector<16x128xf32>
    %2 = tpu.matmul %0, %1, %cst {dimension_numbers = #tpu.dot_dimension_numbers<[1], [0], [0], [1], [0, 0, 1, 1], [], []>} : vector<16x32xbf16>, vector<32x128xbf16>, vector<16x128xf32> -> vector<16x128xf32>
    %c0_3 = arith.constant 0 : index
    %c0_4 = arith.constant 0 : index
    %3 = vector.load %arg3[%c0_3, %c0_4] : memref<1x128xf32, #tpu.memory_space<vmem>>, vector<1x128xf32>
    %4 = vector.broadcast %3 : vector<1x128xf32> to vector<16x128xf32>
    %5 = arith.addf %2, %4 : vector<16x128xf32>
    %cst_5 = arith.constant 0.000000e+00 : f32
    %6 = vector.broadcast %cst_5 : f32 to vector<16x128xf32>
    %7 = arith.subf %6, %5 : vector<16x128xf32>
    %8 = math.exp %7 : vector<16x128xf32>
    %cst_6 = arith.constant 1.000000e+00 : f32
    %9 = vector.broadcast %cst_6 : f32 to vector<16x128xf32>
    %10 = arith.addf %9, %8 : vector<16x128xf32>
    %11 = tpu.reciprocal %10 {approx = true} : vector<16x128xf32> -> vector<16x128xf32>
    %12 = arith.truncf %11 : vector<16x128xf32> to vector<16x128xbf16>
    %c0_7 = arith.constant 0 : index
    %c0_8 = arith.constant 0 : index
    %13 = vector.load %arg4[%c0_7, %c0_8] : memref<128x128xbf16, #tpu.memory_space<vmem>>, vector<128x128xbf16>
    %cst_9 = arith.constant dense<0.000000e+00> : vector<16x128xf32>
    %14 = tpu.matmul %12, %13, %cst_9 {dimension_numbers = #tpu.dot_dimension_numbers<[1], [0], [0], [1], [0, 0, 1, 1], [], []>} : vector<16x128xbf16>, vector<128x128xbf16>, vector<16x128xf32> -> vector<16x128xf32>
    %c0_10 = arith.constant 0 : index
    %c0_11 = arith.constant 0 : index
    %15 = vector.load %arg5[%c0_10, %c0_11] : memref<1x128xf32, #tpu.memory_space<vmem>>, vector<1x128xf32>
    %16 = vector.broadcast %15 : vector<1x128xf32> to vector<16x128xf32>
    %17 = arith.addf %14, %16 : vector<16x128xf32>
    %c0_12 = arith.constant 0 : index
    %c0_13 = arith.constant 0 : index
    %18 = vector.load %arg6[%c0_12, %c0_13] : memref<16x128xf32, #tpu.memory_space<vmem>>, vector<16x128xf32>
    tpu.vector_store %arg6[%c0_12, %c0_13], %17 {strides = array<i32>} : memref<16x128xf32, #tpu.memory_space<vmem>>, vector<16x128xf32>,
    return
  }
  func.func @transform_0(%arg0: i32) -> (i32, i32) {
    %c0_i32 = arith.constant 0 : i32
    %c0_i32_0 = arith.constant 0 : i32
    return %arg0, %c0_i32 : i32, i32
  }
  func.func @transform_1(%arg0: i32) -> (i32, i32) {
    %c0_i32 = arith.constant 0 : i32
    %c0_i32_0 = arith.constant 0 : i32
    %c0_i32_1 = arith.constant 0 : i32
    return %c0_i32, %c0_i32_0 : i32, i32
  }
  func.func @transform_2(%arg0: i32) -> (i32, i32) {
    %c0_i32 = arith.constant 0 : i32
    %c0_i32_0 = arith.constant 0 : i32
    %c0_i32_1 = arith.constant 0 : i32
    return %c0_i32, %c0_i32_0 : i32, i32
  }
  func.func @transform_3(%arg0: i32) -> (i32, i32) {
    %c0_i32 = arith.constant 0 : i32
    %c0_i32_0 = arith.constant 0 : i32
    %c0_i32_1 = arith.constant 0 : i32
    return %c0_i32, %c0_i32_0 : i32, i32
  }
  func.func @transform_4(%arg0: i32) -> (i32, i32) {
    %c0_i32 = arith.constant 0 : i32
    %c0_i32_0 = arith.constant 0 : i32
    %c0_i32_1 = arith.constant 0 : i32
    return %c0_i32, %c0_i32_0 : i32, i32
  }
  func.func @transform_5(%arg0: i32) -> (i32, i32) {
    %c0_i32 = arith.constant 0 : i32
    %c0_i32_0 = arith.constant 0 : i32
    return %arg0, %c0_i32 : i32, i32
  }
}

</mosaic_0001>

<bundles_post_ra>
// kernel: tpu_custom_call.1
= control target key start
LH: loop header
LB: loop body
LE: loop exit
PB: predicated region body
PF: predicated region fallthrough
CT: control target
= control target key end

     0   :  { %10 = vsyncpa [#allocation3], 0  ;;  %s568_s0 = inlined_call_operand.hbm [shape: bf16[16,32], index: 0, kind: input, shape index: {}]   ;;  %s569_s1 = inlined_call_operand.hbm [shape: bf16[32,128], index: 1, kind: input, shape index: {}]   ;;  %s570_s2 = inlined_call_operand.vmem [shape: f32[1,128], index: 2, kind: input, shape index: {}]   ;;  %s571_s3 = inlined_call_operand.hbm [shape: bf16[128,128], index: 3, kind: input, shape index: {}]   ;;  %s572_s4 = inlined_call_operand.vmem [shape: f32[1,128], index: 4, kind: input, shape index: {}]   ;;  %s573_s5 = inlined_call_operand.hbm [shape: f32[16,128], index: 5, kind: output, shape index: {}]  }
   0x1   :  { %11 = vsyncpa [#allocation6], 0 }
   0x2   :  { %12 = vsyncpa [#allocation4], 0  ;;  %s458_s18 = smov [#allocation5]   ;;  %s459_s20 = smov [#allocation2]  }
   0x3   :  { %s30_s19 = sshll.u32 %s458_s18, 4  ;;  %s18_s21 = sshll.u32 %s459_s20, 4  ;;  %s31_s19 = int_to_ptr.vmem [resolvable:$true] %s30_s19  ;;  %s498_s21 = int_to_ptr.vmem [resolvable:$true] %s18_s21 }
   0x4   :  { %s364_s24 = scalar_lea.hbm %s569_s1, 256 }
   0x5   :  { %p365_p0 = scmp.ne.s32.totalorder %s569_s1, %s364_s24  ;;  %p368_p1 = scmp.lt.u32.totalorder %s364_s24, %s569_s1 }
   0x7   :  { %p370_p2 = pnand %p368_p1, %p365_p0 }
   0x9   :  { %373 = shalt.err (!%p370_p2)
}
   0xa   :  { %s374_s29 = scalar_lea.vmem %s31_s19, 256  ;;  %p379_p4 = scmp.lt.s32.totalorder %s31_s19, %s31_s19 }
   0xb   :  { %p375_p3 = scmp.ne.s32.totalorder %s31_s19, %s374_s29  ;;  %p380_p5 = scmp.lt.s32.totalorder %s374_s29, %s374_s29 }
   0xd   :  { %p381_p6 = por %p380_p5, %p379_p4 }
   0xf   :  { %p382_p7 = pnand %p381_p6, %p375_p3 }
  0x11   :  { %385 = shalt.err (!%p382_p7)
}
  0x12   :  { %s460_s30 = smov 64   ;;  %s461_s6 = smov 4  }
  0x13   :  { %36 = dma.hbm_to_vmem [thread:$0]  %s569_s1, 256, %s31_s19, [#allocation6], %s460_s30, %s460_s30, %s461_s6  }
  0x14   :  { %s386_s11 = scalar_lea.hbm %s568_s0, 128 }
  0x15   :  { %p387_p8 = scmp.ne.s32.totalorder %s568_s0, %s386_s11  ;;  %p390_p9 = scmp.lt.u32.totalorder %s386_s11, %s568_s0 }
  0x17   :  { %p392_p10 = pnand %p390_p9, %p387_p8 }
  0x19   :  { %395 = shalt.err (!%p392_p10)
}
  0x1a   :  { %s396_s16 = scalar_lea.vmem %s498_s21, 128  ;;  %p401_p12 = scmp.lt.s32.totalorder %s498_s21, %s498_s21 }
  0x1b   :  { %p397_p11 = scmp.ne.s32.totalorder %s498_s21, %s396_s16  ;;  %p402_p13 = scmp.lt.s32.totalorder %s396_s16, %s396_s16 }
  0x1d   :  { %p403_p0 = por %p402_p13, %p401_p12 }
  0x1f   :  { %p404_p1 = pnand %p403_p0, %p397_p11 }
  0x21   :  { %407 = shalt.err (!%p404_p1)
}
  0x22   :  { %24 = dma.hbm_to_vmem [thread:$0]  %s568_s0, 128, %s498_s21, [#allocation3], %s460_s30, %s460_s30, %s461_s6  }
  0x23   :  { %s462_s18 = smov [#allocation7]   ;;  %s408_s23 = scalar_lea.hbm %s571_s3, 1024 }
  0x24   :  { %s44_s19 = sshll.u32 %s462_s18, 4  ;;  %p409_p2 = scmp.ne.s32.totalorder %s571_s3, %s408_s23  ;;  %s45_s19 = int_to_ptr.vmem [resolvable:$true] %s44_s19 }
  0x25   :  { %p412_p3 = scmp.lt.u32.totalorder %s408_s23, %s571_s3 }
  0x27   :  { %p414_p4 = pnand %p412_p3, %p409_p2 }
  0x29   :  { %417 = shalt.err (!%p414_p4)
}
  0x2a   :  { %s418_s28 = scalar_lea.vmem %s45_s19, 1024  ;;  %p423_p6 = scmp.lt.s32.totalorder %s45_s19, %s45_s19 }
  0x2b   :  { %p419_p5 = scmp.ne.s32.totalorder %s45_s19, %s418_s28  ;;  %p424_p7 = scmp.lt.s32.totalorder %s418_s28, %s418_s28 }
  0x2d   :  { %p425_p8 = por %p424_p7, %p423_p6 }
  0x2f   :  { %p426_p9 = pnand %p425_p8, %p419_p5 }
  0x31   :  { %429 = shalt.err (!%p426_p9)
}
  0x32   :  { %50 = dma.hbm_to_vmem [thread:$0]  %s571_s3, 1024, %s45_s19, [#allocation6], %s460_s30, %s460_s30, %s461_s6  }
  0x33   :  { %452 = dma.done.wait [#allocation3], 128  }
  0x34   :  { %453 = vsyncadd [#allocation3], 4294967168 }
  0x35   :  { %454 = dma.done.wait [#allocation6], 1280  }
  0x36   :  { %455 = vsyncadd [#allocation6], 4294966016  ;;  %v463_v0 = vmov 0.0   ;;  %vm464_vm0 = vmmov 0   ;;  %v345_v1 = vld [vmem:[#allocation5] sm:$0xff]   ;;  %v346_v2 = vld [vmem:[#allocation5 + $0x8] sm:$0xff]  }
  0x37   :  { %307 = vmatprep.subr.bf16.mxu0 %v463_v0  ;;  %311 = vmatprep.mubr.msk.bf16.mxu0 %vm464_vm0, %v463_v0  ;;  %v347_v3 = vld [vmem:[#allocation2] sm:$0xff]   ;;  %vm93_vm1 = vcmask 261120   ;;  %v348_v4 = vld [vmem:[#allocation7] sm:$0xff]   ;;  %v350_v6 = vld [vmem:[#allocation7 + $0x10] sm:$0xff]   ;;  %s465_s6 = smov [#allocation8]  }
  0x38   :  { %315 = vmatprep.subr.bf16.mxu1 %v463_v0  ;;  %331 = vmatprep.mubr.msk.bf16.mxu1 %vm464_vm0, %v463_v0  ;;  %v349_v5 = vld [vmem:[#allocation7 + $0x8] sm:$0xff]   ;;  %v351_v7 = vld [vmem:[#allocation7 + $0x18] sm:$0xff]   ;;  %v352_v8 = vld [vmem:[#allocation7 + $0x20] sm:$0xff]   ;;  %s268_s7 = sshll.u32 %s465_s6, 4  ;;  %s269_s7 = int_to_ptr.vmem [resolvable:$true] %s268_s7 }
  0x39   :  { %308 = vmatpush3.bf16.msra.mxu0 %v345_v1  ;;  %316 = vmatpush3.bf16.msra.mxu1 %v348_v4  ;;  %v353_v9 = vld [vmem:[#allocation7 + $0x28] sm:$0xff]   ;;  %v354_v10 = vld [vmem:[#allocation7 + $0x30] sm:$0xff]   ;;  %v355_v11 = vld [vmem:[#allocation7 + $0x38] sm:$0xff]   ;;  %s430_s8 = scalar_lea.vmem %s269_s7, 256  ;;  %p435_p11 = scmp.lt.s32.totalorder %s269_s7, %s269_s7 }
  0x3a   :  { %309 = vmatprep.subr.bf16.mxu0 %v463_v0  ;;  %317 = vmatprep.subr.bf16.mxu1 %v463_v0  ;;  %v281_v12 = vld [vmem:[%s570_s2] ss:$0 sm:$0xff]  ;;  %p431_p10 = scmp.ne.s32.totalorder %s269_s7, %s430_s8  ;;  %p436_p12 = scmp.lt.s32.totalorder %s430_s8, %s430_s8 }
  0x3b   :  { %v286_v30 = vld [vmem:[%s572_s4] ss:$0 sm:$0xff] }
  0x3c   :  { %p437_p13 = por %p436_p12, %p435_p11 }
  0x3d   :  { %310 = vmatpush3.bf16.msra.mxu0 %v346_v2  ;;  %318 = vmatpush3.bf16.msra.mxu1 %v349_v5 }
  0x3e   :  { %319 = vmatprep.subr.bf16.mxu1 %v463_v0  ;;  %p438_p0 = pnand %p437_p13, %p431_p10 }
  0x40   :  { %312 = vmatmul.mubr.msk.bf16.vlgmr.msra.gmra.mrb[0].mxu0 %vm93_vm1, %v347_v3 }
  0x41   :  { %320 = vmatpush3.bf16.msra.mxu1 %v350_v6 }
  0x42   :  { %321 = vmatprep.subr.bf16.mxu1 %v463_v0 }
  0x45   :  { %322 = vmatpush3.bf16.msra.mxu1 %v351_v7 }
  0x46   :  { %323 = vmatprep.subr.bf16.mxu1 %v463_v0 }
  0x49   :  { %324 = vmatpush3.bf16.msra.mxu1 %v352_v8 }
  0x4a   :  { %325 = vmatprep.subr.bf16.mxu1 %v463_v0 }
  0x4d   :  { %326 = vmatpush3.bf16.msra.mxu1 %v353_v9 }
  0x4e   :  { %327 = vmatprep.subr.bf16.mxu1 %v463_v0 }
  0x51   :  { %328 = vmatpush3.bf16.msra.mxu1 %v354_v10 }
  0x52   :  { %329 = vmatprep.subr.bf16.mxu1 %v463_v0 }
  0x55   :  { %330 = vmatpush3.bf16.msra.mxu1 %v355_v11 }
 0x113   :  { %v131_v13 = vpop.f32.mrb[0].mxu0 }
 0x114   :  { %v132_v14 = vadd.f32 %v281_v12, %v131_v13  ;;  %v313_v15 = vpop.f32.mrb[1].mxu0 }
 0x115   :  { %v134_v16 = vpop.f32.mrb[2].mxu0 }
 0x116   :  { %v138_v17 = vsub.f32 0.0, %v132_v14  ;;  %v135_v18 = vadd.f32 %v281_v12, %v134_v16  ;;  %v314_v19 = vpop.f32.mrb[3].mxu0 }
 0x118   :  { %v140_v20 = vmul.f32 1.442695, %v138_v17  ;;  %v139_v21 = vsub.f32 0.0, %v135_v18 }
 0x11a   :  { %356 = vpow2.f32 %v140_v20  ;;  %v142_v22 = vmul.f32 1.442695, %v139_v21 }
 0x11c   :  { %358 = vpow2.f32 %v142_v22 }
 0x124   :  { %v357_v23 = vpop.eup %356 }
 0x125   :  { %v144_v24 = vadd.f32 1.0, %v357_v23 }
 0x126   :  { %v359_v25 = vpop.eup %358 }
 0x127   :  { %v145_v26 = vadd.f32 1.0, %v359_v25  ;;  %360 = vrcp.f32 %v144_v24 }
 0x129   :  { %362 = vrcp.f32 %v145_v26 }
 0x131   :  { %v361_v27 = vpop.eup %360 }
 0x133   :  { %v363_v28 = vpop.eup %362 }
 0x134   :  { %v148_v29 = vpack.c.bf16 %v363_v28, %v361_v27 }
 0x136   :  { %332 = vmatmul.mubr.bf16.vlgmr.msra.gmra.mrb[0].mxu1 %v148_v29 }
 0x209   :  { %v254_v31 = vpop.f32.mrb[0].mxu1 }
 0x20a   :  { %v255_v32 = vadd.f32 %v286_v30, %v254_v31  ;;  %v333_v33 = vpop.f32.mrb[1].mxu1 }
 0x20b   :  { %v257_v34 = vpop.f32.mrb[2].mxu1 }
 0x20c   :  { %261 = vst [vmem:[#allocation8] sm:$0xff] %v255_v32  ;;  %v258_v35 = vadd.f32 %v286_v30, %v257_v34  ;;  %v334_v36 = vpop.f32.mrb[3].mxu1 }
 0x20e   :  { %262 = vst [vmem:[#allocation8 + $0x8] sm:$0xff] %v258_v35 }
 0x20f   :  { %441 = shalt.err (!%p438_p0)
}
 0x210   :  { %s442_s10 = scalar_lea.hbm %s573_s5, 256 }
 0x211   :  { %p443_p1 = scmp.ne.s32.totalorder %s573_s5, %s442_s10  ;;  %p446_p2 = scmp.lt.u32.totalorder %s442_s10, %s573_s5 }
 0x213   :  { %p448_p3 = pnand %p446_p2, %p443_p1 }
 0x215   :  { %451 = shalt.err (!%p448_p3)
}
 0x216   :  { %s466_s15 = smov 128   ;;  %s467_s16 = smov 8  }
 0x217   :  { %274 = dma.vmem_to_hbm [thread:$0]  %s269_s7, 256, %s573_s5, [#allocation4], %s466_s15, %s466_s15, %s467_s16  }
 0x218   :  { %456 = dma.done.wait [#allocation4], 256  }
 0x219   :  { %457 = vsyncadd [#allocation4], 4294967040 }
 0x21a   :  { %278 = vsyncpa [#allocation3], 1 }
 0x21b   :  { %279 = vsyncpa [#allocation6], 1 }
 0x21c   :  { %280 = vsyncpa [#allocation4], 1 }

</bundles_post_ra>
